<compile_context>
chip_gen: v7x
topology: tpu7x:2x2x1
jax: 0.10.0
libtpu: 0.0.40
codegen_flags: <defaults>
</compile_context>

<pallas_src>
import jax
import jax.numpy as jnp
from jax import lax
from jax.experimental import pallas as pl
from jax.experimental.pallas import tpu as pltpu

M = 7000                      # hidden width from the torch module
M_PAD = 7168                  # 56 * 128, lane-aligned padding of M
TH = 3584                     # hidden-dim tile -> 2 grid steps (overlap kept)


def _mfld_kernel(x_ref, w1_ref, b1_ref, w2t_ref, b2_ref, o_ref, acc_ref):
    """One grid step processes a TH-wide slice of the hidden layer.

    pre    = x(bf16) @ W1[:, h](bf16)  (MXU, f32 acc) + b1[h](f32)
    hidden = tanh(pre)                 (EUP)           -> bf16
    acc   += hidden · W2t[:, h]^T      (MXU, contract hidden axis, f32 acc)
    last   : out = acc + b2            (1/M already folded into W2t / b2)
    """
    h = pl.program_id(0)

    @pl.when(h == 0)
    def _():
        acc_ref[...] = jnp.zeros_like(acc_ref)

    pre = jnp.dot(
        x_ref[...].astype(jnp.bfloat16), w1_ref[...],
        preferred_element_type=jnp.float32,
    ) + b1_ref[...]
    hidden = jnp.tanh(pre).astype(jnp.bfloat16)          # (B, TH) bf16

    # W2 is lane-dense (out, M_PAD); contract the TH axis of both operands:
    #   (B, TH) . (out, TH)^T -> (B, out)
    acc_ref[...] += lax.dot_general(
        hidden, w2t_ref[...],
        dimension_numbers=(((1,), (1,)), ((), ())),
        preferred_element_type=jnp.float32,
    )

    @pl.when(h == pl.num_programs(0) - 1)
    def _():
        o_ref[...] = (acc_ref[...] + b2_ref[...]).astype(o_ref.dtype)


@jax.jit
def mfld_forward(x, w1p, b1p, w2tp, b2p):
    """x: (B, in) f32, w1p: (in, M_PAD) bf16, b1p: (1, M_PAD) f32,
    w2tp: (out, M_PAD) bf16 (already scaled by 1/M), b2p: (1, out) f32 (already /M)."""
    B, in_size = x.shape
    out_size = w2tp.shape[0]
    n_tiles = M_PAD // TH

    # TODO(synk): for large serving batches on v7x, add a leading "parallel"
    # grid axis that tiles B so both TensorCores get half the batch; the hidden
    # axis must stay "arbitrary" (it is a reduction into acc_ref).
    return pl.pallas_call(
        _mfld_kernel,
        out_shape=jax.ShapeDtypeStruct((B, out_size), x.dtype),
        grid_spec=pltpu.PrefetchScalarGridSpec(
            num_scalar_prefetch=0,
            grid=(n_tiles,),
            in_specs=[
                pl.BlockSpec((B, in_size), lambda h: (0, 0)),      # x (resident)
                pl.BlockSpec((in_size, TH), lambda h: (0, h)),     # W1 tile (bf16)
                pl.BlockSpec((1, TH), lambda h: (0, h)),           # b1 tile (f32)
                pl.BlockSpec((out_size, TH), lambda h: (0, h)),    # W2 tile, lane-dense (bf16)
                pl.BlockSpec((1, out_size), lambda h: (0, 0)),     # b2 (resident, pre-scaled)
            ],
            out_specs=pl.BlockSpec((B, out_size), lambda h: (0, 0)),
            scratch_shapes=[pltpu.VMEM((B, out_size), jnp.float32)],
        ),
        compiler_params=pltpu.CompilerParams(
            dimension_semantics=("arbitrary",),    # hidden dim is a reduction axis
            vmem_limit_bytes=32 << 20,             # tiles are < 1 MiB; plenty on v5e/v6e/v7x
        ),
    )(x, w1p, b1p, w2tp, b2p)


def init_params(key, input_size, output_size):
    """Deterministic init mimicking torch.nn.Linear (U[-1/sqrt(fan_in), 1/sqrt(fan_in)]).

    Returns kernel-layout params (padded, bf16 weights, 1/M folded) and the
    plain f32 math params for the reference.
    """
    k1, k2, k3, k4 = jax.random.split(key, 4)
    lim1 = 1.0 / jnp.sqrt(input_size)
    lim2 = 1.0 / jnp.sqrt(M)

    # fc1: torch weight (M, in) -> kept transposed as (in, M); fc2: torch (out, M) kept as-is.
    w1 = jax.random.uniform(k1, (input_size, M), jnp.float32, -lim1, lim1)
    b1 = jax.random.uniform(k2, (M,), jnp.float32, -lim1, lim1)
    w2 = jax.random.uniform(k3, (output_size, M), jnp.float32, -lim2, lim2)
    b2 = jax.random.uniform(k4, (output_size,), jnp.float32, -lim2, lim2)

    # Kernel layout: zero-pad hidden dim, weights -> bf16, fold the 1/M scale.
    w1p = jnp.zeros((input_size, M_PAD), jnp.bfloat16).at[:, :M].set(
        w1.astype(jnp.bfloat16))
    b1p = jnp.zeros((1, M_PAD), jnp.float32).at[:, :M].set(b1)
    w2tp = jnp.zeros((output_size, M_PAD), jnp.bfloat16).at[:, :M].set(
        (w2 * (1.0 / M)).astype(jnp.bfloat16))
    b2p = (b2 * (1.0 / M)).reshape(1, output_size)
    return (w1p, b1p, w2tp, b2p), (w1, b1, w2, b2)


def reference_forward_f32(x, w1, b1, w2, b2):
    h = jnp.tanh(x @ w1 + b1)
    return (h @ w2.T + b2) / M


def reference_forward_bf16(x, w1, b1, w2, b2):
    """Reference that applies the same bf16 quantization the kernel uses."""
    q = lambda a: a.astype(jnp.bfloat16).astype(jnp.float32)
    h = jnp.tanh(q(x) @ q(w1) + b1)
    return q(h) @ q(w2 * (1.0 / M)).T + b2 / M


if __name__ == "__main__":
    key = jax.random.PRNGKey(0)
    kx, kp = jax.random.split(key)

    B, input_size, output_size = 8, 32, 16
    x = jax.random.normal(kx, (B, input_size), jnp.float32)

    (w1p, b1p, w2tp, b2p), (w1, b1, w2, b2) = init_params(kp, input_size, output_size)

    y = mfld_forward(x, w1p, b1p, w2tp, b2p)
    y = jax.block_until_ready(y)
    assert y.shape == (B, output_size)

    # Tight check against a reference with the same bf16 weight/activation quantization.
    y_bf = reference_forward_bf16(x, w1, b1, w2, b2)
    assert jnp.allclose(y, y_bf, atol=5e-6, rtol=1e-2), "mismatch vs bf16-quantized reference"

    # Loose sanity check against the full-f32 torch-equivalent reference
    # (bf16 weights => relaxed tolerance, as expected).
    y_f32 = reference_forward_f32(x, w1, b1, w2, b2)
    assert jnp.allclose(y, y_f32, atol=5e-5, rtol=1e-1), "mismatch vs f32 reference"

    print("KERNEL_OK")
</pallas_src>

<mosaic_0001>
module attributes {stable_mosaic.version = 11 : i64} {
  func.func @_mfld_kernel(%arg0: i32, %arg1: memref<8x32xf32, #tpu.memory_space<vmem>>, %arg2: memref<32x3584xbf16, #tpu.memory_space<vmem>>, %arg3: memref<1x3584xf32, #tpu.memory_space<vmem>>, %arg4: memref<16x3584xbf16, #tpu.memory_space<vmem>>, %arg5: memref<1x16xf32, #tpu.memory_space<vmem>>, %arg6: memref<8x16xf32, #tpu.memory_space<vmem>>, %arg7: memref<8x16xf32, #tpu.memory_space<vmem>>) attributes {dimension_semantics = [#tpu.dimension_semantics<arbitrary>], iteration_bounds = array<i64: 2>, scalar_prefetch = 0 : i64, scratch_operands = 1 : i64, tpu.core_type = #tpu.core_type<tc>, window_params = [{pipeline_mode = #tpu.pipeline_mode<synchronous>, transform_indices = @transform_0, window_bounds = array<i64: 8, 32>}, {transform_indices = @transform_1, window_bounds = array<i64: 32, 3584>}, {transform_indices = @transform_2, window_bounds = array<i64: 1, 3584>}, {transform_indices = @transform_3, window_bounds = array<i64: 16, 3584>}, {pipeline_mode = #tpu.pipeline_mode<synchronous>, transform_indices = @transform_4, window_bounds = array<i64: 1, 16>}, {pipeline_mode = #tpu.pipeline_mode<synchronous>, transform_indices = @transform_5, window_bounds = array<i64: 8, 16>}]} {
    %c0_i32 = arith.constant 0 : i32
    %0 = arith.cmpi eq, %arg0, %c0_i32 : i32
    %1 = arith.extui %0 : i1 to i32
    %c0_i32_0 = arith.constant 0 : i32
    %2 = arith.cmpi ne, %1, %c0_i32_0 : i32
    scf.if %2 {
      %cst_14 = arith.constant 0.000000e+00 : f32
      %20 = vector.broadcast %cst_14 : f32 to vector<8x16xf32>
      %c0_15 = arith.constant 0 : index
      %c0_16 = arith.constant 0 : index
      %21 = vector.load %arg7[%c0_15, %c0_16] : memref<8x16xf32, #tpu.memory_space<vmem>>, vector<8x16xf32>
      tpu.vector_store %arg7[%c0_15, %c0_16], %20 {strides = array<i32>} : memref<8x16xf32, #tpu.memory_space<vmem>>, vector<8x16xf32>,
    } else {
    }
    %c0 = arith.constant 0 : index
    %c0_1 = arith.constant 0 : index
    %3 = vector.load %arg1[%c0, %c0_1] : memref<8x32xf32, #tpu.memory_space<vmem>>, vector<8x32xf32>
    %4 = arith.truncf %3 : vector<8x32xf32> to vector<8x32xbf16>
    %c0_2 = arith.constant 0 : index
    %c0_3 = arith.constant 0 : index
    %5 = vector.load %arg2[%c0_2, %c0_3] : memref<32x3584xbf16, #tpu.memory_space<vmem>>, vector<32x3584xbf16>
    %cst = arith.constant dense<0.000000e+00> : vector<8x3584xf32>
    %6 = tpu.matmul %4, %5, %cst {dimension_numbers = #tpu.dot_dimension_numbers<[1], [0], [0], [1], [0, 0, 1, 1], [], []>} : vector<8x32xbf16>, vector<32x3584xbf16>, vector<8x3584xf32> -> vector<8x3584xf32>
    %c0_4 = arith.constant 0 : index
    %c0_5 = arith.constant 0 : index
    %7 = vector.load %arg3[%c0_4, %c0_5] : memref<1x3584xf32, #tpu.memory_space<vmem>>, vector<1x3584xf32>
    %8 = vector.broadcast %7 : vector<1x3584xf32> to vector<8x3584xf32>
    %9 = arith.addf %6, %8 : vector<8x3584xf32>
    %10 = math.tanh %9 : vector<8x3584xf32>
    %11 = arith.truncf %10 : vector<8x3584xf32> to vector<8x3584xbf16>
    %c0_6 = arith.constant 0 : index
    %c0_7 = arith.constant 0 : index
    %12 = vector.load %arg7[%c0_6, %c0_7] : memref<8x16xf32, #tpu.memory_space<vmem>>, vector<8x16xf32>
    %c0_8 = arith.constant 0 : index
    %c0_9 = arith.constant 0 : index
    %13 = vector.load %arg4[%c0_8, %c0_9] : memref<16x3584xbf16, #tpu.memory_space<vmem>>, vector<16x3584xbf16>
    %cst_10 = arith.constant dense<0.000000e+00> : vector<8x16xf32>
    %14 = tpu.matmul %11, %13, %cst_10 {dimension_numbers = #tpu.dot_dimension_numbers<[1], [1], [0], [0], [0, 0, 1, 0], [], []>} : vector<8x3584xbf16>, vector<16x3584xbf16>, vector<8x16xf32> -> vector<8x16xf32>
    %15 = arith.addf %12, %14 : vector<8x16xf32>
    %c0_11 = arith.constant 0 : index
    %c0_12 = arith.constant 0 : index
    %16 = vector.load %arg7[%c0_11, %c0_12] : memref<8x16xf32, #tpu.memory_space<vmem>>, vector<8x16xf32>
    tpu.vector_store %arg7[%c0_11, %c0_12], %15 {strides = array<i32>} : memref<8x16xf32, #tpu.memory_space<vmem>>, vector<8x16xf32>,
    %c1_i32 = arith.constant 1 : i32
    %17 = arith.cmpi eq, %arg0, %c1_i32 : i32
    %18 = arith.extui %17 : i1 to i32
    %c0_i32_13 = arith.constant 0 : i32
    %19 = arith.cmpi ne, %18, %c0_i32_13 : i32
    scf.if %19 {
      %c0_14 = arith.constant 0 : index
      %c0_15 = arith.constant 0 : index
      %20 = vector.load %arg7[%c0_14, %c0_15] : memref<8x16xf32, #tpu.memory_space<vmem>>, vector<8x16xf32>
      %c0_16 = arith.constant 0 : index
      %c0_17 = arith.constant 0 : index
      %21 = vector.load %arg5[%c0_16, %c0_17] : memref<1x16xf32, #tpu.memory_space<vmem>>, vector<1x16xf32>
      %22 = vector.broadcast %21 : vector<1x16xf32> to vector<8x16xf32>
      %23 = arith.addf %20, %22 : vector<8x16xf32>
      %c0_18 = arith.constant 0 : index
      %c0_19 = arith.constant 0 : index
      %24 = vector.load %arg6[%c0_18, %c0_19] : memref<8x16xf32, #tpu.memory_space<vmem>>, vector<8x16xf32>
      tpu.vector_store %arg6[%c0_18, %c0_19], %23 {strides = array<i32>} : memref<8x16xf32, #tpu.memory_space<vmem>>, vector<8x16xf32>,
    } else {
    }
    return
  }
  func.func @transform_0(%arg0: i32) -> (i32, i32) {
    %c0_i32 = arith.constant 0 : i32
    %c0_i32_0 = arith.constant 0 : i32
    %c0_i32_1 = arith.constant 0 : i32
    return %c0_i32, %c0_i32_0 : i32, i32
  }
  func.func @transform_1(%arg0: i32) -> (i32, i32) {
    %c0_i32 = arith.constant 0 : i32
    %c0_i32_0 = arith.constant 0 : i32
    return %c0_i32, %arg0 : i32, i32
  }
  func.func @transform_2(%arg0: i32) -> (i32, i32) {
    %c0_i32 = arith.constant 0 : i32
    %c0_i32_0 = arith.constant 0 : i32
    return %c0_i32, %arg0 : i32, i32
  }
  func.func @transform_3(%arg0: i32) -> (i32, i32) {
    %c0_i32 = arith.constant 0 : i32
    %c0_i32_0 = arith.constant 0 : i32
    return %c0_i32, %arg0 : i32, i32
  }
  func.func @transform_4(%arg0: i32) -> (i32, i32) {
    %c0_i32 = arith.constant 0 : i32
    %c0_i32_0 = arith.constant 0 : i32
    %c0_i32_1 = arith.constant 0 : i32
    return %c0_i32, %c0_i32_0 : i32, i32
  }
  func.func @transform_5(%arg0: i32) -> (i32, i32) {
    %c0_i32 = arith.constant 0 : i32
    %c0_i32_0 = arith.constant 0 : i32
    %c0_i32_1 = arith.constant 0 : i32
    return %c0_i32, %c0_i32_0 : i32, i32
  }
}

</mosaic_0001>

<bundles_post_ra>
// kernel: mfld_forward.1
= control target key start
LH: loop header
LB: loop body
LE: loop exit
PB: predicated region body
PF: predicated region fallthrough
CT: control target
= control target key end

     0   :  { %s3372_s0 = inlined_call_operand.hbm [shape: f32[8,32], index: 0, kind: input, shape index: {}]   ;;  %s3373_s1 = inlined_call_operand.hbm [shape: bf16[32,7168], index: 1, kind: input, shape index: {}]   ;;  %s3374_s2 = inlined_call_operand.hbm [shape: f32[1,7168], index: 2, kind: input, shape index: {}]   ;;  %s3375_s3 = inlined_call_operand.hbm [shape: bf16[16,7168], index: 3, kind: input, shape index: {}]   ;;  %s3376_s4 = inlined_call_operand.vmem [shape: f32[1,16], index: 4, kind: input, shape index: {}]   ;;  %s3377_s5 = inlined_call_operand.hbm [shape: f32[8,16], index: 5, kind: output, shape index: {}]  }
   0x1   :  { %3389 = sst [smem:[#allocation16_spill]] %s3373_s1 }
   0x2   :  { %10 = vsyncpa [#allocation4], 0 }
   0x3   :  { %11 = vsyncpa [#allocation7], 0 }
   0x4   :  { %13 = vsyncpa [#allocation7 + $0x1], 0 }
   0x5   :  { %14 = vsyncpa [#allocation10], 0 }
   0x6   :  { %16 = vsyncpa [#allocation10 + $0x1], 0 }
   0x7   :  { %17 = vsyncpa [#allocation5], 0  ;;  %s2916_s18 = smov 0   ;;  %s2918_s19 = smov 0  }
   0x8   :  { %s2920_s20 = smov 0   ;;  %s2922_s21 = smov 0  }
   0x9 LB: > { %s2937_s22 = sadd.s32 1, %s2874_s21   ;;  %s51_s23 = sadd.s32 1, %s2870_s20  ;;  %s2874_s21 = sphi %s2922_s21, %s3410_s21   ;;  %s2870_s20 = sphi %s2920_s20, %s3409_s20   ;;  %s2866_s19 = sphi %s2918_s19, %s3408_s19   ;;  %s2862_s18 = sphi %s2916_s18, %s3407_s18  }
   0xa   : > { %s48_s24 = ssub.s32 %s2874_s21, %s2937_s22  ;;  %p58_p0 = scmp.ne.s32.totalorder %s2870_s20, %s2866_s19 }
   0xb   : > { %p49_p1 = scmp.eq.s32.totalorder %s48_s24, 0  ;;  %p59_p2 = scmp.eq.s32.totalorder %s2874_s21, 0 }
   0xc   : > { %p2459_p3 = scmp.lt.s32.totalorder %s2874_s21, 2  ;;  %s196_s26 = sand.u32 1, %s2874_s21  }
   0xd   : > { %s2947_s25 = scalar_select %p49_p1, %s2870_s20, %s51_s23  }
   0xe   : > { %p60_p4 = por %p59_p2, %p58_p0  ;;  %s2951_s27 = sand.u32 1, %s2870_s20  }
   0xf   : > { %s2424_s28 = smul.u32 448, %s2951_s27  ;;  %s3391_s1 = sld [smem:[#allocation16_spill]] }
  0x10   : > { %p2954_p5 = pnand %p2459_p3, %p60_p4  ;;  %s3381_s30 = smul.u32 1792, %s2874_s21 }
  0x11   : > { %s200_s9 = scalar_lea.vmem [#allocation6], %s2424_s28  ;;  %s2968_s11 = scalar_lea.sflag [#allocation7], %s196_s26 }
  0x12   : > { %s3390_s29 = scalar_select %p2954_p5, 1, 0 }
  0x13   : > { %s207_s10 = sshll.u32 %s200_s9, 4  ;;  %p2974_p7 = pneg %p2954_p5  ;;  %s2966_s10 = int_to_ptr.vmem [resolvable:$true] %s207_s10 }
  0x15   : > { %s2964_s8 = scalar_lea.hbm %s3391_s1, %s3381_s30  ;;  %s2689_s16 = scalar_lea.hbm %s3391_s1, 14336 }
  0x16   : > { %s2684_s12 = scalar_lea.hbm %s2964_s8, 7168  ;;  %p2690_p10 = scmp.lt.u32.totalorder %s2964_s8, %s3391_s1 }
  0x17   : > { %p2685_p6 = scmp.ne.s32.totalorder %s2964_s8, %s2684_s12  ;;  %p2691_p11 = scmp.lt.u32.totalorder %s2689_s16, %s2684_s12 }
  0x18   : > { %s3392_s13 = scalar_select %p2974_p7, 1, 0 }
  0x19   : > { %p2687_p8 = pnand %p2974_p7, %p2685_p6  ;;  %p2692_p12 = por %p2691_p11, %p2690_p10 }
  0x1a   : > { %p2693_p13 = scmp.lt.u32.totalorder %s2684_s12, %s2964_s8 }
  0x1b   : > { %p2688_p9 = pneg %p2687_p8 }
  0x1c   : > { %p2694_p0 = por %p2693_p13, %p2692_p12 }
  0x1e   : > { %p2695_p1 = pnand %p2694_p0, %p2688_p9 }
  0x20   : > { %2698 = shalt.err (!%p2695_p1)
}
  0x21   : > { %s2699_s24 = scalar_lea.vmem %s2966_s10, 7168  ;;  %s2876_s26 = smov [#allocation6]  }
  0x22   : > { %p2700_p2 = scmp.ne.s32.totalorder %s2966_s10, %s2699_s24  ;;  %s2704_s28 = sshll.u32 %s2876_s26, 4  ;;  %s2705_s28 = int_to_ptr.vmem [resolvable:$false] %s2704_s28 }
  0x23   : > { %s2706_s6 = scalar_lea.vmem %s2705_s28, 14336  ;;  %p2707_p6 = scmp.lt.s32.totalorder %s2966_s10, %s2705_s28 }
  0x24   : > { %p2702_p3 = pnand %p2700_p2, %p2974_p7  ;;  %p2708_p8 = scmp.lt.s32.totalorder %s2706_s6, %s2699_s24 }
  0x26   : > { %p2703_p4 = pneg %p2702_p3  ;;  %p2709_p10 = por %p2708_p8, %p2707_p6 }
  0x28   : > { %p2710_p11 = pnand %p2709_p10, %p2703_p4 }
  0x2a   : > { %2713 = shalt.err (!%p2710_p11)
}
  0x2b   : > { %s3378_s7 = smov 3584   ;;  %s3379_s9 = smov 1792  }
  0x2c   : > { %s3380_s12 = smov 112   ;;  %s3002_s14 = sadd.s32 4294967295, %s2874_s21  }
  0x2d   : > { %2451 = dma.hbm_to_vmem [thread:$0]  (!%p2954_p5), %s2964_s8, 7168, %s2966_s10, %s2968_s11, %s3378_s7, %s3379_s9, %s3380_s12  }
  0x2e   : > { %p64_p9 = scmp.ne.s32.totalorder %s2866_s19, %s2862_s18  ;;  %p3382_p12 = scmp.eq.s32.totalorder %s3002_s14, 0 }
  0x2f   : > { %p2308_p13 = scmp.ge.s32.totalorder %s2874_s21, 1  ;;  %p169_p0 = scmp.lt.s32.totalorder %s2874_s21, 3 }
  0x30   : > { %p3011_p1 = por %p3382_p12, %p64_p9  ;;  %s2880_s8 = smov [#allocation3]  }
  0x31   : > { %p3016_p3 = pnand %p2308_p13, %p169_p0  ;;  %s182_s10 = sshll.u32 %s2880_s8, 4  ;;  %s183_s10 = int_to_ptr.vmem [resolvable:$true] %s182_s10 }
  0x32   : > { %s3393_s15 = scalar_select %p3011_p1, 1, 0 }
  0x33   : > { %s3394_s16 = scalar_select %p3016_p3, 1, 0 }
  0x34   : > { %s2425_s17 = smul.u32 28, %s2951_s27  ;;  %p2444_p4 = pneg %p3016_p3 }
  0x35   : > { %s2422_s18 = smul.u32 448, %s2874_s21  ;;  %s2714_s12 = scalar_lea.hbm %s3372_s0, 128 }
  0x36   : > { %p3026_p6 = pnand %p2444_p4, %p3382_p12  ;;  %s221_s24 = scalar_lea.vmem [#allocation8], %s2425_s17 }
  0x37   : > { %s229_s26 = sshll.u32 %s221_s24, 4  ;;  %s3033_s7 = scalar_lea.hbm %s3374_s2, %s2422_s18  ;;  %s3035_s26 = int_to_ptr.vmem [resolvable:$true] %s229_s26 }
  0x38   : > { %p2715_p8 = scmp.ne.s32.totalorder %s3372_s0, %s2714_s12  ;;  %p2716_p10 = pneg %p3026_p6 }
  0x39   : > { %p2721_p13 = scmp.lt.u32.totalorder %s2714_s12, %s3372_s0 }
  0x3a   : > { %p2717_p11 = pnand %p2716_p10, %p2715_p8 }
  0x3c   : > { %p2718_p9 = pneg %p2717_p11 }
  0x3e   : > { %p2723_p0 = pnand %p2721_p13, %p2718_p9 }
  0x40   : > { %2726 = shalt.err (!%p2723_p0)
}
  0x41   : > { %s2727_s18 = scalar_lea.vmem %s183_s10, 128  ;;  %p2735_p1 = scmp.lt.s32.totalorder %s183_s10, %s183_s10 }
  0x42   : > { %p2728_p4 = scmp.ne.s32.totalorder %s183_s10, %s2727_s18  ;;  %p2736_p3 = scmp.lt.s32.totalorder %s2727_s18, %s2727_s18 }
  0x44   : > { %p2730_p2 = pnand %p2728_p4, %p2716_p10  ;;  %p2737_p5 = por %p2736_p3, %p2735_p1 }
  0x46   : > { %p2731_p12 = pneg %p2730_p2 }
  0x48   : > { %p2738_p7 = pnand %p2737_p5, %p2731_p12 }
  0x4a   : > { %2741 = shalt.err (!%p2738_p7)
}
  0x4b   : > { %2447 = dma.hbm_to_vmem [thread:$0]  (!%p3026_p6), %s3372_s0, 128, %s183_s10, [#allocation4]  }
  0x4c   : > { %s2742_s9 = scalar_lea.hbm %s3033_s7, 448  ;;  %p3396_p10 = scmp.ne.s32.totalorder %s3392_s13, 0 }
  0x4d   : > { %p2743_p8 = scmp.ne.s32.totalorder %s3033_s7, %s2742_s9  ;;  %s2747_s6 = scalar_lea.hbm %s3374_s2, 896 }
  0x4e   : > { %p2748_p5 = scmp.lt.u32.totalorder %s3033_s7, %s3374_s2  ;;  %p2749_p7 = scmp.lt.u32.totalorder %s2747_s6, %s2742_s9 }
  0x4f   : > { %p2745_p2 = pnand %p2743_p8, %p3396_p10  ;;  %p2751_p1 = scmp.lt.u32.totalorder %s2742_s9, %s3033_s7 }
  0x50   : > { %p2750_p12 = por %p2749_p7, %p2748_p5 }
  0x51   : > { %p2746_p11 = pneg %p2745_p2 }
  0x52   : > { %p2752_p3 = por %p2751_p1, %p2750_p12 }
  0x54   : > { %p2753_p9 = pnand %p2752_p3, %p2746_p11 }
  0x56   : > { %2756 = shalt.err (!%p2753_p9)
}
  0x57   : > { %s2757_s10 = scalar_lea.vmem %s3035_s26, 448  ;;  %s2881_s17 = smov [#allocation8]  }
  0x58   : > { %p2758_p6 = scmp.ne.s32.totalorder %s3035_s26, %s2757_s10  ;;  %s2762_s24 = sshll.u32 %s2881_s17, 4  ;;  %s2763_s24 = int_to_ptr.vmem [resolvable:$false] %s2762_s24 }
  0x59   : > { %s2764_s18 = scalar_lea.vmem %s2763_s24, 896  ;;  %p2765_p4 = scmp.lt.s32.totalorder %s3035_s26, %s2763_s24 }
  0x5a   : > { %p2760_p13 = pnand %p2758_p6, %p3396_p10  ;;  %p2766_p8 = scmp.lt.s32.totalorder %s2764_s18, %s2757_s10 }
  0x5c   : > { %p2761_p0 = pneg %p2760_p13  ;;  %p2767_p2 = por %p2766_p8, %p2765_p4 }
  0x5e   : > { %p2768_p5 = pnand %p2767_p2, %p2761_p0 }
  0x60   : > { %2771 = shalt.err (!%p2768_p5)
}
  0x61   : > { %p3397_p11 = scmp.ne.s32.totalorder %s3390_s29, 0  ;;  %s2426_s1 = smul.u32 224, %s2951_s27 }
  0x62   : > { %s3398_s30 = smul.u32 1792, %s2874_s21  ;;  %s237_s23 = scalar_lea.sflag [#allocation10], %s2951_s27 }
  0x63   : > { %2454 = dma.hbm_to_vmem [thread:$0]  (!%p3397_p11), %s3033_s7, 448, %s3035_s26, %s2968_s11  }
  0x64   : > { %s3081_s28 = scalar_lea.hbm %s3375_s3, %s3398_s30  ;;  %s240_s6 = scalar_lea.vmem [#allocation9], %s2426_s1 }
  0x65   : > { %s247_s8 = sshll.u32 %s240_s6, 4  ;;  %s2772_s10 = scalar_lea.hbm %s3081_s28, 3584  ;;  %s3083_s8 = int_to_ptr.vmem [resolvable:$true] %s247_s8 }
  0x66   : > { %p2773_p7 = scmp.ne.s32.totalorder %s3081_s28, %s2772_s10  ;;  %s2777_s7 = scalar_lea.hbm %s3375_s3, 7168 }
  0x67   : > { %p2778_p3 = scmp.lt.u32.totalorder %s3081_s28, %s3375_s3  ;;  %p2779_p9 = scmp.lt.u32.totalorder %s2777_s7, %s2772_s10 }
  0x68   : > { %p2775_p12 = pnand %p2773_p7, %p3396_p10  ;;  %p2781_p13 = scmp.lt.u32.totalorder %s2772_s10, %s3081_s28 }
  0x69   : > { %p2780_p6 = por %p2779_p9, %p2778_p3 }
  0x6a   : > { %p2776_p1 = pneg %p2775_p12 }
  0x6b   : > { %p2782_p0 = por %p2781_p13, %p2780_p6 }
  0x6d   : > { %p2783_p4 = pnand %p2782_p0, %p2776_p1 }
  0x6f   : > { %2786 = shalt.err (!%p2783_p4)
}
  0x70   : > { %s2787_s24 = scalar_lea.vmem %s3083_s8, 3584  ;;  %s2882_s18 = smov [#allocation9]  }
  0x71   : > { %p2788_p8 = scmp.ne.s32.totalorder %s3083_s8, %s2787_s24  ;;  %s2792_s1 = sshll.u32 %s2882_s18, 4  ;;  %s2793_s1 = int_to_ptr.vmem [resolvable:$false] %s2792_s1 }
  0x72   : > { %s2794_s30 = scalar_lea.vmem %s2793_s1, 7168  ;;  %p2795_p7 = scmp.lt.s32.totalorder %s3083_s8, %s2793_s1 }
  0x73   : > { %p2790_p2 = pnand %p2788_p8, %p3396_p10  ;;  %p2796_p12 = scmp.lt.s32.totalorder %s2794_s30, %s2787_s24 }
  0x75   : > { %p2791_p5 = pneg %p2790_p2  ;;  %p2797_p3 = por %p2796_p12, %p2795_p7 }
  0x77   : > { %p2798_p9 = pnand %p2797_p3, %p2791_p5 }
  0x79   : > { %2801 = shalt.err (!%p2798_p9)
}
  0x7a   : > { %s3399_s9 = smov 112   ;;  %s3400_s12 = smov 1792  }
  0x7b   : > { %s3401_s6 = smov 3584   ;;  %p3402_p10 = scmp.ne.s32.totalorder %s3394_s16, 0 }
  0x7c   : > { %2457 = dma.hbm_to_vmem [thread:$0]  (!%p3397_p11), %s3081_s28, 3584, %s3083_s8, %s237_s23, %s3401_s6, %s3400_s12, %s3399_s9  }
  0x7d   : > { %259 = sbr.rel (%p3402_p10) target bundleno = 694 (0x2b6), region = 40  ;;  %p3403_p1 = scmp.eq.s32.totalorder (!%p3402_p10), %s3002_s14, 0 }
  0x84   : > { %2845 = dma.done.wait (%p3403_p1), [#allocation4], 128   ;;  %p3404_p6 = pmov %p3403_p1 }
  0x85   : > { %s265_s29 = sand.u32 1, %s3002_s14   ;;  %s267_s13 = sand.u32 1, %s2866_s19  }
  0x86   : > { %2847 = vsyncadd (%p3404_p6), [#allocation4], 4294967168  ;;  %s2427_s10 = smul.u32 448, %s267_s13  ;;  %s266_s21 = scalar_lea.sflag [#allocation7], %s265_s29 }
  0x87   : > { %p3405_p13 = scmp.ne.s32.totalorder %s3393_s15, 0 }
  0x88   : > { %s3120_s27 = scalar_lea.vmem [#allocation6], %s2427_s10 }
  0x89   : > { %2849 = dma.done.wait (%p3405_p13), %s266_s21, 7616  }
  0x8a   : > { %2851 = vsyncadd (%p3405_p13), %s266_s21, 4294959680  ;;  %s2428_s16 = smul.u32 28, %s267_s13  ;;  %s284_s23 = scalar_lea.sflag [#allocation10], %s267_s13 }
  0x8b   : > { %s2429_s28 = smul.u32 224, %s267_s13 }
  0x8c   : > { %s3126_s8 = scalar_lea.vmem [#allocation8], %s2428_s16 }
  0x8d   : > { %s3128_s11 = scalar_lea.vmem [#allocation9], %s2429_s28 }
  0x8e   : > { %2853 = dma.done.wait (%p3405_p13), %s284_s23, 3584  }
  0x8f   : > { %2855 = vsyncadd (%p3405_p13), %s284_s23, 4294963712  ;;  %p3406_p11 = scmp.ne.s32.totalorder %s3002_s14, 0 }
  0x90   : > { %vm327_vm0 = vcmask (!%p3406_p11), 130048   ;;  %v2883_v0 = vmov (!%p3406_p11), 0.0  }
  0x91   : > { %326 = sbr.rel (%p3406_p11) target bundleno = 152 (0x98), region = 60  ;;  %328 = vst.msk [vmem:[#allocation2] sm:$0xff] (!%p3406_p11), %vm327_vm0, %v2883_v0 }
  0x98 PF: > { %v2502_v1 = vld [vmem:[%s3120_s27 + $0x4] ss:$112 sps:$4 sm:$0xff]   ;;  %v2504_v2 = vld [vmem:[%s3120_s27 + $0xc] ss:$112 sps:$4 sm:$0xff]   ;;  %v2884_v3 = vmov 0   ;;  %vm815_vm1 = vcmask 261120  }
  0x99   : > { %851 = vmatprep.mubr.bf16.mxu0 %v2884_v3  ;;  %892 = vmatprep.mubr.bf16.mxu1 %v2884_v3  ;;  %v2506_v4 = vld [vmem:[%s3120_s27] ss:$112 sps:$4 sm:$0xff]   ;;  %v2507_v5 = vld [vmem:[%s3120_s27 + $0x8] ss:$112 sps:$4 sm:$0xff]   ;;  %v2508_v6 = vld [vmem:[%s3120_s27 + $0xe4] ss:$112 sps:$4 sm:$0xff]  }
  0x9a   : > { %819 = vmatprep.subr.bf16.mxu0 %v2502_v1  ;;  %860 = vmatprep.subr.bf16.mxu1 %v2504_v2  ;;  %v2510_v7 = vld [vmem:[%s3120_s27 + $0xec] ss:$112 sps:$4 sm:$0xff]   ;;  %v2512_v8 = vld [vmem:[%s3120_s27 + $0xe0] ss:$112 sps:$4 sm:$0xff]   ;;  %v2513_v9 = vld [vmem:[%s3120_s27 + $0xe8] ss:$112 sps:$4 sm:$0xff]   ;;  %v395_v2 = vlaneseq }
  0x9b   : > { %820 = vmatpush1.bf16.msra.mxu0 %v2506_v4  ;;  %861 = vmatpush1.bf16.msra.mxu1 %v2507_v5  ;;  %v329_v10 = vld [vmem:[#allocation3] sm:$0xff]  ;;  %v2514_v11 = vld [vmem:[%s3120_s27 + $0x10] ss:$112 sps:$4 sm:$0xff]   ;;  %v2516_v12 = vld [vmem:[%s3120_s27 + $0x14] ss:$112 sps:$4 sm:$0xff]   ;;  %vm2179_vm2 = vcmask 130048  }
  0x9c   : > { %821 = vmatprep.subr.bf16.mxu0 %v2508_v6  ;;  %862 = vmatprep.subr.bf16.mxu1 %v2510_v7  ;;  %v3148_v13 = vpack.c.bf16 %v329_v10, %v329_v10  ;;  %v2517_v14 = vld [vmem:[%s3120_s27 + $0x18] ss:$112 sps:$4 sm:$0xff]   ;;  %v2519_v15 = vld [vmem:[%s3120_s27 + $0x1c] ss:$112 sps:$4 sm:$0xff]   ;;  %v2522_v16 = vld [vmem:[%s3120_s27 + $0xf4] ss:$112 sps:$4 sm:$0xff]  }
  0x9d   : > { %v2525_v17 = vld [vmem:[%s3120_s27 + $0xfc] ss:$112 sps:$4 sm:$0xff]   ;;  %v2520_v18 = vld [vmem:[%s3120_s27 + $0xf0] ss:$112 sps:$4 sm:$0xff]   ;;  %v2523_v19 = vld [vmem:[%s3120_s27 + $0xf8] ss:$112 sps:$4 sm:$0xff]  }
  0x9e   : > { %v2528_v20 = vld [vmem:[%s3120_s27 + $0x24] ss:$112 sps:$4 sm:$0xff]   ;;  %v2531_v21 = vld [vmem:[%s3120_s27 + $0x2c] ss:$112 sps:$4 sm:$0xff]   ;;  %v2526_v22 = vld [vmem:[%s3120_s27 + $0x20] ss:$112 sps:$4 sm:$0xff]  }
  0x9f   : > { %822 = vmatpush1.bf16.msra.mxu0 %v2512_v8  ;;  %863 = vmatpush1.bf16.msra.mxu1 %v2513_v9  ;;  %v2529_v23 = vld [vmem:[%s3120_s27 + $0x28] ss:$112 sps:$4 sm:$0xff]   ;;  %v2534_v24 = vld [vmem:[%s3120_s27 + $0x104] ss:$112 sps:$4 sm:$0xff]   ;;  %v2537_v25 = vld [vmem:[%s3120_s27 + $0x10c] ss:$112 sps:$4 sm:$0xff]  }
  0xa0   : > { %901 = vmatprep.subr.bf16.mxu0 %v2516_v12  ;;  %942 = vmatprep.subr.bf16.mxu1 %v2519_v15  ;;  %v2532_v26 = vld [vmem:[%s3120_s27 + $0x100] ss:$112 sps:$4 sm:$0xff]   ;;  %v2535_v27 = vld [vmem:[%s3120_s27 + $0x108] ss:$112 sps:$4 sm:$0xff]   ;;  %v2540_v28 = vld [vmem:[%s3120_s27 + $0x34] ss:$112 sps:$4 sm:$0xff]  }
  0xa1   : > { %v2543_v29 = vld [vmem:[%s3120_s27 + $0x3c] ss:$112 sps:$4 sm:$0xff]   ;;  %v2538_v30 = vld [vmem:[%s3120_s27 + $0x30] ss:$112 sps:$4 sm:$0xff]   ;;  %v2541_v31 = vld [vmem:[%s3120_s27 + $0x38] ss:$112 sps:$4 sm:$0xff]  }
  0xa2   : > { %2373 = vmatmul.mubr.msk.bf16.vlgmr.msra.gmra.mrb[0].mxu0 %vm815_vm1, %v3148_v13  ;;  %2374 = vmatmul.mubr.msk.bf16.vlgmr.msra.gmra.mrb[0].mxu1 %vm815_vm1, %v3148_v13  ;;  %v2546_v32 = vld [vmem:[%s3120_s27 + $0x114] ss:$112 sps:$4 sm:$0xff]   ;;  %v2549_v33 = vld [vmem:[%s3120_s27 + $0x11c] ss:$112 sps:$4 sm:$0xff]   ;;  %v2544_v34 = vld [vmem:[%s3120_s27 + $0x110] ss:$112 sps:$4 sm:$0xff]  }
  0xa3   : > { %902 = vmatpush1.bf16.msra.mxu0 %v2514_v11  ;;  %943 = vmatpush1.bf16.msra.mxu1 %v2517_v14  ;;  %v2547_v35 = vld [vmem:[%s3120_s27 + $0x118] ss:$112 sps:$4 sm:$0xff]   ;;  %v2552_v36 = vld [vmem:[%s3120_s27 + $0x44] ss:$112 sps:$4 sm:$0xff]   ;;  %v2555_v37 = vld [vmem:[%s3120_s27 + $0x4c] ss:$112 sps:$4 sm:$0xff]  }
  0xa4   : > { %903 = vmatprep.subr.bf16.mxu0 %v2522_v16  ;;  %944 = vmatprep.subr.bf16.mxu1 %v2525_v17  ;;  %v2550_v38 = vld [vmem:[%s3120_s27 + $0x40] ss:$112 sps:$4 sm:$0xff]   ;;  %v2553_v39 = vld [vmem:[%s3120_s27 + $0x48] ss:$112 sps:$4 sm:$0xff]   ;;  %v2558_v40 = vld [vmem:[%s3120_s27 + $0x124] ss:$112 sps:$4 sm:$0xff]  }
  0xa5   : > { %933 = vmatprep.mubr.bf16.mxu0 %v2884_v3  ;;  %974 = vmatprep.mubr.bf16.mxu1 %v2884_v3  ;;  %v2561_v41 = vld [vmem:[%s3120_s27 + $0x12c] ss:$112 sps:$4 sm:$0xff]   ;;  %v2556_v42 = vld [vmem:[%s3120_s27 + $0x120] ss:$112 sps:$4 sm:$0xff]   ;;  %v2559_v43 = vld [vmem:[%s3120_s27 + $0x128] ss:$112 sps:$4 sm:$0xff]  }
  0xa6   : > { %v2564_v44 = vld [vmem:[%s3120_s27 + $0x54] ss:$112 sps:$4 sm:$0xff]   ;;  %v2567_v45 = vld [vmem:[%s3120_s27 + $0x5c] ss:$112 sps:$4 sm:$0xff]   ;;  %v2562_v46 = vld [vmem:[%s3120_s27 + $0x50] ss:$112 sps:$4 sm:$0xff]  }
  0xa7   : > { %904 = vmatpush1.bf16.msra.mxu0 %v2520_v18  ;;  %945 = vmatpush1.bf16.msra.mxu1 %v2523_v19  ;;  %v2565_v47 = vld [vmem:[%s3120_s27 + $0x58] ss:$112 sps:$4 sm:$0xff]   ;;  %v2570_v48 = vld [vmem:[%s3120_s27 + $0x134] ss:$112 sps:$4 sm:$0xff]   ;;  %v2573_v49 = vld [vmem:[%s3120_s27 + $0x13c] ss:$112 sps:$4 sm:$0xff]  }
  0xa8   : > { %983 = vmatprep.subr.bf16.mxu0 %v2528_v20  ;;  %1024 = vmatprep.subr.bf16.mxu1 %v2531_v21  ;;  %v2568_v50 = vld [vmem:[%s3120_s27 + $0x130] ss:$112 sps:$4 sm:$0xff]   ;;  %v2571_v51 = vld [vmem:[%s3120_s27 + $0x138] ss:$112 sps:$4 sm:$0xff]   ;;  %v2576_v52 = vld [vmem:[%s3120_s27 + $0x64] ss:$112 sps:$4 sm:$0xff]  }
  0xa9   : > { %v2579_v53 = vld [vmem:[%s3120_s27 + $0x6c] ss:$112 sps:$4 sm:$0xff]   ;;  %v2574_v54 = vld [vmem:[%s3120_s27 + $0x60] ss:$112 sps:$4 sm:$0xff]   ;;  %v2577_v55 = vld [vmem:[%s3120_s27 + $0x68] ss:$112 sps:$4 sm:$0xff]  }
  0xaa   : > { %2375 = vmatmul.mubr.msk.bf16.vlgmr.msra.gmra.mrb[4].mxu0 %vm815_vm1, %v3148_v13  ;;  %2376 = vmatmul.mubr.msk.bf16.vlgmr.msra.gmra.mrb[4].mxu1 %vm815_vm1, %v3148_v13  ;;  %v2582_v56 = vld [vmem:[%s3120_s27 + $0x144] ss:$112 sps:$4 sm:$0xff]   ;;  %v2585_v57 = vld [vmem:[%s3120_s27 + $0x14c] ss:$112 sps:$4 sm:$0xff]   ;;  %v2580_v58 = vld [vmem:[%s3120_s27 + $0x140] ss:$112 sps:$4 sm:$0xff]  }
  0xab   : > { %984 = vmatpush1.bf16.msra.mxu0 %v2526_v22  ;;  %1025 = vmatpush1.bf16.msra.mxu1 %v2529_v23  ;;  %v2583_v59 = vld [vmem:[%s3120_s27 + $0x148] ss:$112 sps:$4 sm:$0xff]   ;;  %v2588_v60 = vld [vmem:[%s3128_s11 + $0x4] ss:$112 sps:$4 sm:$0xff]   ;;  %v2591_v61 = vld [vmem:[%s3128_s11 + $0xc] ss:$112 sps:$4 sm:$0xff]  }
  0xac   : > { %985 = vmatprep.subr.bf16.mxu0 %v2534_v24  ;;  %1026 = vmatprep.subr.bf16.mxu1 %v2537_v25  ;;  %v2586_v62 = vld [vmem:[%s3128_s11] ss:$112 sps:$4 sm:$0xff]   ;;  %v2589_v63 = vld [vmem:[%s3128_s11 + $0x8] ss:$112 sps:$4 sm:$0xff]   ;;  %v2594_v0 = vld [vmem:[%s3128_s11 + $0x14] ss:$112 sps:$4 sm:$0xff]  }
  0xad   : > { %1015 = vmatprep.mubr.bf16.mxu0 %v2884_v3  ;;  %1056 = vmatprep.mubr.bf16.mxu1 %v2884_v3  ;;  %v2597_v1 = vld [vmem:[%s3128_s11 + $0x1c] ss:$112 sps:$4 sm:$0xff]   ;;  %p2415_p0 = scmp.ne.s32.totalorder %s3002_s14, 1 }
  0xae   : > { %v387_v6 = vld [vmem:[%s3126_s8] sm:$0xff] }
  0xaf   : > { %986 = vmatpush1.bf16.msra.mxu0 %v2532_v26  ;;  %1027 = vmatpush1.bf16.msra.mxu1 %v2535_v27 }
  0xb0   : > { %1065 = vmatprep.subr.bf16.mxu0 %v2540_v28  ;;  %1106 = vmatprep.subr.bf16.mxu1 %v2543_v29 }
  0xb2   : > { %2377 = vmatmul.mubr.msk.bf16.vlgmr.msra.gmra.mrb[8].mxu0 %vm815_vm1, %v3148_v13  ;;  %2378 = vmatmul.mubr.msk.bf16.vlgmr.msra.gmra.mrb[8].mxu1 %vm815_vm1, %v3148_v13 }
  0xb3   : > { %1066 = vmatpush1.bf16.msra.mxu0 %v2538_v30  ;;  %1107 = vmatpush1.bf16.msra.mxu1 %v2541_v31 }
  0xb4   : > { %1067 = vmatprep.subr.bf16.mxu0 %v2546_v32  ;;  %1108 = vmatprep.subr.bf16.mxu1 %v2549_v33 }
  0xb5   : > { %1097 = vmatprep.mubr.bf16.mxu0 %v2884_v3  ;;  %1138 = vmatprep.mubr.bf16.mxu1 %v2884_v3 }
  0xb7   : > { %1068 = vmatpush1.bf16.msra.mxu0 %v2544_v34  ;;  %1109 = vmatpush1.bf16.msra.mxu1 %v2547_v35 }
  0xb8   : > { %1147 = vmatprep.subr.bf16.mxu0 %v2552_v36  ;;  %1188 = vmatprep.subr.bf16.mxu1 %v2555_v37 }
  0xba   : > { %2379 = vmatmul.mubr.msk.bf16.vlgmr.msra.gmra.mrb[12].mxu0 %vm815_vm1, %v3148_v13  ;;  %2380 = vmatmul.mubr.msk.bf16.vlgmr.msra.gmra.mrb[12].mxu1 %vm815_vm1, %v3148_v13 }
  0xbb   : > { %1148 = vmatpush1.bf16.msra.mxu0 %v2550_v38  ;;  %1189 = vmatpush1.bf16.msra.mxu1 %v2553_v39 }
  0xbc   : > { %1149 = vmatprep.subr.bf16.mxu0 %v2558_v40  ;;  %1190 = vmatprep.subr.bf16.mxu1 %v2561_v41 }
  0xbd   : > { %1179 = vmatprep.mubr.bf16.mxu0 %v2884_v3  ;;  %1220 = vmatprep.mubr.bf16.mxu1 %v2884_v3 }
  0xbf   : > { %1150 = vmatpush1.bf16.msra.mxu0 %v2556_v42  ;;  %1191 = vmatpush1.bf16.msra.mxu1 %v2559_v43  ;;  %v3268_v43 = vld [vmem:[%s3126_s8 + $0x8] sm:$0xff] }
  0xc0   : > { %1229 = vmatprep.subr.bf16.mxu0 %v2564_v44  ;;  %1270 = vmatprep.subr.bf16.mxu1 %v2567_v45 }
  0xc2   : > { %2381 = vmatmul.mubr.msk.bf16.vlgmr.msra.gmra.mrb[16].mxu0 %vm815_vm1, %v3148_v13  ;;  %2382 = vmatmul.mubr.msk.bf16.vlgmr.msra.gmra.mrb[16].mxu1 %vm815_vm1, %v3148_v13 }
  0xc3   : > { %1230 = vmatpush1.bf16.msra.mxu0 %v2562_v46  ;;  %1271 = vmatpush1.bf16.msra.mxu1 %v2565_v47 }
  0xc4   : > { %1231 = vmatprep.subr.bf16.mxu0 %v2570_v48  ;;  %1272 = vmatprep.subr.bf16.mxu1 %v2573_v49 }
  0xc5   : > { %1261 = vmatprep.mubr.bf16.mxu0 %v2884_v3  ;;  %1302 = vmatprep.mubr.bf16.mxu1 %v2884_v3 }
  0xc7   : > { %1232 = vmatpush1.bf16.msra.mxu0 %v2568_v50  ;;  %1273 = vmatpush1.bf16.msra.mxu1 %v2571_v51 }
  0xc8   : > { %1311 = vmatprep.subr.bf16.mxu0 %v2576_v52  ;;  %1352 = vmatprep.subr.bf16.mxu1 %v2579_v53 }
  0xca   : > { %2383 = vmatmul.mubr.msk.bf16.vlgmr.msra.gmra.mrb[20].mxu0 %vm815_vm1, %v3148_v13  ;;  %2384 = vmatmul.mubr.msk.bf16.vlgmr.msra.gmra.mrb[20].mxu1 %vm815_vm1, %v3148_v13 }
  0xcb   : > { %1312 = vmatpush1.bf16.msra.mxu0 %v2574_v54  ;;  %1353 = vmatpush1.bf16.msra.mxu1 %v2577_v55 }
  0xcc   : > { %1313 = vmatprep.subr.bf16.mxu0 %v2582_v56  ;;  %1354 = vmatprep.subr.bf16.mxu1 %v2585_v57 }
  0xcd   : > { %1343 = vmatprep.mubr.bf16.mxu0 %v2884_v3  ;;  %1384 = vmatprep.mubr.bf16.mxu1 %v2884_v3  ;;  %v396_v3 = vshrl.u32 %v395_v2, 7  ;;  %v2600_v2 = vld [vmem:[%s3128_s11 + $0x24] ss:$112 sps:$4 sm:$0xff]  }
  0xcf   : > { %1314 = vmatpush1.bf16.msra.mxu0 %v2580_v58  ;;  %1355 = vmatpush1.bf16.msra.mxu1 %v2583_v59  ;;  %v3242_v4 = vsub.s32 0, %v396_v3  ;;  %v3244_v5 = vsub.s32 2, %v396_v3  ;;  %v3247_v7 = vsub.s32 1, %v396_v3  ;;  %v3249_v8 = vsub.s32 3, %v396_v3  ;;  %v2592_v58 = vld [vmem:[%s3128_s11 + $0x10] ss:$112 sps:$4 sm:$0xff]  }
  0xd0   : > { %1618 = vmatprep.subr.bf16.mxu0 %v2588_v60  ;;  %1658 = vmatprep.subr.bf16.mxu1 %v2591_v61  ;;  %v3255_v19 = vsub.s32 4, %v396_v3  ;;  %v3257_v20 = vsub.s32 6, %v396_v3  ;;  %v3259_v25 = vsub.s32 5, %v396_v3  ;;  %v3261_v26 = vsub.s32 7, %v396_v3 }
  0xd1   : > { %v398_v9 = vrot.slane %v387_v6, %v3242_v4  ;;  %v406_v10 = vrot.slane %v387_v6, %v3244_v5  ;;  %v402_v11 = vrot.slane %v387_v6, %v3247_v7  ;;  %v410_v12 = vrot.slane %v387_v6, %v3249_v8 }
  0xd2   : > { %2385 = vmatmul.mubr.msk.bf16.vlgmr.msra.gmra.mrb[24].mxu0 %vm815_vm1, %v3148_v13  ;;  %2386 = vmatmul.mubr.msk.bf16.vlgmr.msra.gmra.mrb[24].mxu1 %vm815_vm1, %v3148_v13  ;;  %v414_v29 = vrot.slane %v387_v6, %v3255_v19  ;;  %v422_v30 = vrot.slane %v387_v6, %v3257_v20  ;;  %v418_v31 = vrot.slane %v387_v6, %v3259_v25 }
  0xd3   : > { %v426_v32 = vrot.slane %v387_v6, %v3261_v26  ;;  %v430_v47 = vrot.slane %v3268_v43, %v3242_v4  ;;  %v438_v48 = vrot.slane %v3268_v43, %v3244_v5  ;;  %v434_v50 = vrot.slane %v3268_v43, %v3247_v7 }
  0xd4   : > { %v442_v51 = vrot.slane %v3268_v43, %v3249_v8 }
  0xd8   : > { %1619 = vmatpush1.bf16.xpose.msra.mxu0 %v2586_v62  ;;  %1659 = vmatpush1.bf16.xpose.msra.mxu1 %v2589_v63 }
  0xd9   : > { %1698 = vmatprep.subr.bf16.mxu0 %v2594_v0  ;;  %1738 = vmatprep.subr.bf16.mxu1 %v2597_v1  ;;  %v2595_v1 = vld [vmem:[%s3128_s11 + $0x18] ss:$112 sps:$4 sm:$0xff]  }
 0x175   : > { %v853_v13 = vpop.f32.mrb[0].mxu0  ;;  %v894_v14 = vpop.f32.mrb[0].mxu1 }
 0x176   : > { %v854_v15 = vadd.f32 %v853_v13, %v398_v9  ;;  %v895_v16 = vadd.f32 %v894_v14, %v406_v10  ;;  %v855_v17 = vpop.f32.mrb[1].mxu0  ;;  %v896_v18 = vpop.f32.mrb[1].mxu1 }
 0x177   : > { %v856_v21 = vadd.f32 %v855_v17, %v402_v11  ;;  %v897_v22 = vadd.f32 %v896_v18, %v410_v12  ;;  %v857_v23 = vpop.f32.mrb[2].mxu0  ;;  %v898_v24 = vpop.f32.mrb[2].mxu1  ;;  %v2603_v11 = vld [vmem:[%s3128_s11 + $0x2c] ss:$112 sps:$4 sm:$0xff]   ;;  %v450_v18 = vrot.slane %v3268_v43, %v3259_v25 }
 0x178   : > { %2628 = vtanh.f32 %v854_v15  ;;  %v858_v27 = vpop.f32.mrb[3].mxu0  ;;  %v899_v28 = vpop.f32.mrb[3].mxu1  ;;  %v446_v15 = vrot.slane %v3268_v43, %v3255_v19 }
 0x179   : > { %2630 = vtanh.f32 %v895_v16  ;;  %v454_v16 = vrot.slane %v3268_v43, %v3257_v20 }
 0x17a   : > { %2632 = vtanh.f32 %v856_v21  ;;  %v458_v21 = vrot.slane %v3268_v43, %v3261_v26  ;;  %v3294_v43 = vld [vmem:[%s3126_s8 + $0x10] sm:$0xff] }
 0x17b   : > { %2634 = vtanh.f32 %v897_v22 }
 0x17d   : > { %v935_v33 = vpop.f32.mrb[4].mxu0  ;;  %v976_v34 = vpop.f32.mrb[4].mxu1 }
 0x17e   : > { %v936_v35 = vadd.f32 %v935_v33, %v414_v29  ;;  %v977_v36 = vadd.f32 %v976_v34, %v422_v30  ;;  %v937_v37 = vpop.f32.mrb[5].mxu0  ;;  %v978_v38 = vpop.f32.mrb[5].mxu1  ;;  %v2598_v30 = vld [vmem:[%s3128_s11 + $0x20] ss:$112 sps:$4 sm:$0xff]  }
 0x17f   : > { %v938_v39 = vadd.f32 %v937_v37, %v418_v31  ;;  %v979_v40 = vadd.f32 %v978_v38, %v426_v32  ;;  %v939_v41 = vpop.f32.mrb[6].mxu0  ;;  %v980_v42 = vpop.f32.mrb[6].mxu1  ;;  %v2601_v37 = vld [vmem:[%s3128_s11 + $0x28] ss:$112 sps:$4 sm:$0xff]   ;;  %v2606_v38 = vld [vmem:[%s3128_s11 + $0x34] ss:$112 sps:$4 sm:$0xff]  }
 0x180   : > { %2636 = vtanh.f32 %v936_v35  ;;  %v940_v44 = vpop.f32.mrb[7].mxu0  ;;  %v981_v45 = vpop.f32.mrb[7].mxu1 }
 0x181   : > { %2638 = vtanh.f32 %v977_v36  ;;  %v2609_v44 = vld [vmem:[%s3128_s11 + $0x3c] ss:$112 sps:$4 sm:$0xff]  }
 0x182   : > { %v2629_v46 = vpop.eup %2628  ;;  %2640 = vtanh.f32 %v938_v39 }
 0x183   : > { %v2631_v49 = vpop.eup %2630  ;;  %2642 = vtanh.f32 %v979_v40  ;;  %v1421_v59 = vpack.c.bf16 %v2629_v46, %v2629_v46 }
 0x184   : > { %v2633_v52 = vpop.eup %2632  ;;  %v1423_v54 = vpack.c.bf16 %v2631_v49, %v2631_v49  ;;  %v470_v49 = vrot.slane %v3294_v43, %v3244_v5 }
 0x185   : > { %v2635_v53 = vpop.eup %2634  ;;  %v1422_v55 = vpack.c.bf16 %v2633_v52, %v2633_v52  ;;  %v1017_v56 = vpop.f32.mrb[8].mxu0  ;;  %v474_v52 = vrot.slane %v3294_v43, %v3249_v8 }
 0x186   : > { %v1058_v57 = vpop.f32.mrb[8].mxu1  ;;  %v1424_v60 = vpack.c.bf16 %v2635_v53, %v2635_v53  ;;  %v1018_v61 = vadd.f32 %v1017_v56, %v430_v47  ;;  %v1019_v63 = vpop.f32.mrb[9].mxu0 }
 0x187   : > { %v1059_v62 = vadd.f32 %v1058_v57, %v438_v48  ;;  %v1060_v0 = vpop.f32.mrb[9].mxu1  ;;  %v1020_v3 = vadd.f32 %v1019_v63, %v434_v50  ;;  %1650 = vmatprep.mubr.bf16.mxu0 %v1422_v55  ;;  %v1021_v9 = vpop.f32.mrb[10].mxu0  ;;  %v462_v48 = vrot.slane %v3294_v43, %v3242_v4 }
 0x188   : > { %v1061_v6 = vadd.f32 %v1060_v0, %v442_v51  ;;  %v1062_v10 = vpop.f32.mrb[10].mxu1  ;;  %2644 = vtanh.f32 %v1018_v61  ;;  %1690 = vmatprep.mubr.bf16.mxu1 %v1424_v60  ;;  %1651 = vmatmul.mubr.bf16.vlgmr.msra.gmra.mrb[28].mxu0 %v1421_v59  ;;  %v1022_v12 = vpop.f32.mrb[11].mxu0  ;;  %v466_v51 = vrot.slane %v3294_v43, %v3247_v7  ;;  %v2604_v59 = vld [vmem:[%s3128_s11 + $0x30] ss:$112 sps:$4 sm:$0xff]  }
 0x189   : > { %v1063_v13 = vpop.f32.mrb[11].mxu1  ;;  %2646 = vtanh.f32 %v1059_v62  ;;  %1691 = vmatmul.mubr.bf16.vlgmr.msra.gmra.mrb[28].mxu1 %v1423_v54  ;;  %1699 = vmatpush1.bf16.xpose.msra.mxu0 %v2592_v58  ;;  %v2615_v12 = vld [vmem:[%s3128_s11 + $0x4c] ss:$112 sps:$4 sm:$0xff]  }
 0x18a   : > { %v2637_v14 = vpop.eup %2636  ;;  %2648 = vtanh.f32 %v1020_v3  ;;  %1739 = vmatpush1.bf16.xpose.msra.mxu1 %v2595_v1  ;;  %1778 = vmatprep.subr.bf16.mxu0 %v2600_v2  ;;  %v2607_v2 = vld [vmem:[%s3128_s11 + $0x38] ss:$112 sps:$4 sm:$0xff]   ;;  %v2612_v3 = vld [vmem:[%s3128_s11 + $0x44] ss:$112 sps:$4 sm:$0xff]  }
 0x18b   : > { %v2639_v17 = vpop.eup %2638  ;;  %2650 = vtanh.f32 %v1061_v6  ;;  %1818 = vmatprep.subr.bf16.mxu1 %v2603_v11  ;;  %v1425_v31 = vpack.c.bf16 %v2637_v14, %v2637_v14 }
 0x18c   : > { %v2641_v22 = vpop.eup %2640  ;;  %v1427_v24 = vpack.c.bf16 %v2639_v17, %v2639_v17  ;;  %v486_v17 = vrot.slane %v3294_v43, %v3257_v20  ;;  %v2610_v20 = vld [vmem:[%s3128_s11 + $0x40] ss:$112 sps:$4 sm:$0xff]  }
 0x18d   : > { %v2643_v23 = vpop.eup %2642  ;;  %v1426_v27 = vpack.c.bf16 %v2641_v22, %v2641_v22  ;;  %v1099_v28 = vpop.f32.mrb[12].mxu0  ;;  %v490_v22 = vrot.slane %v3294_v43, %v3261_v26 }
 0x18e   : > { %v1140_v29 = vpop.f32.mrb[12].mxu1  ;;  %v1428_v32 = vpack.c.bf16 %v2643_v23, %v2643_v23  ;;  %v1100_v33 = vadd.f32 %v1099_v28, %v446_v15  ;;  %v1101_v35 = vpop.f32.mrb[13].mxu0 }
 0x18f   : > { %v1141_v34 = vadd.f32 %v1140_v29, %v454_v16  ;;  %v1142_v36 = vpop.f32.mrb[13].mxu1  ;;  %v1102_v39 = vadd.f32 %v1101_v35, %v450_v18  ;;  %1730 = vmatprep.mubr.bf16.mxu0 %v1426_v27  ;;  %v1103_v41 = vpop.f32.mrb[14].mxu0  ;;  %v478_v16 = vrot.slane %v3294_v43, %v3255_v19  ;;  %v2613_v35 = vld [vmem:[%s3128_s11 + $0x48] ss:$112 sps:$4 sm:$0xff]  }
 0x190   : > { %v1143_v40 = vadd.f32 %v1142_v36, %v458_v21  ;;  %v1144_v42 = vpop.f32.mrb[14].mxu1  ;;  %2652 = vtanh.f32 %v1100_v33  ;;  %1770 = vmatprep.mubr.bf16.mxu1 %v1428_v32  ;;  %1731 = vmatmul.mubr.bf16.vlgmr.msra.gmra.mrb[32].mxu0 %v1425_v31  ;;  %v1104_v45 = vpop.f32.mrb[15].mxu0  ;;  %v482_v21 = vrot.slane %v3294_v43, %v3259_v25  ;;  %v2618_v36 = vld [vmem:[%s3128_s11 + $0x54] ss:$112 sps:$4 sm:$0xff]   ;;  %v2621_v41 = vld [vmem:[%s3128_s11 + $0x5c] ss:$112 sps:$4 sm:$0xff]  }
 0x191   : > { %v1145_v46 = vpop.f32.mrb[15].mxu1  ;;  %2654 = vtanh.f32 %v1141_v34  ;;  %1771 = vmatmul.mubr.bf16.vlgmr.msra.gmra.mrb[32].mxu1 %v1427_v24  ;;  %1779 = vmatpush1.bf16.xpose.msra.mxu0 %v2598_v30 }
 0x192   : > { %v2645_v47 = vpop.eup %2644  ;;  %2656 = vtanh.f32 %v1102_v39  ;;  %1819 = vmatpush1.bf16.xpose.msra.mxu1 %v2601_v37  ;;  %1858 = vmatprep.subr.bf16.mxu0 %v2606_v38 }
 0x193   : > { %v2647_v50 = vpop.eup %2646  ;;  %2658 = vtanh.f32 %v1143_v40  ;;  %1898 = vmatprep.subr.bf16.mxu1 %v2609_v44  ;;  %v1429_v60 = vpack.c.bf16 %v2645_v47, %v2645_v47  ;;  %v390_v40 = vld [vmem:[%s3126_s8 + $0x18] sm:$0xf] }
 0x194   : > { %v2649_v53 = vpop.eup %2648  ;;  %v1431_v55 = vpack.c.bf16 %v2647_v50, %v2647_v50  ;;  %v494_v45 = vrot.slane %v390_v40, %v3242_v4  ;;  %v502_v46 = vrot.slane %v390_v40, %v3244_v5  ;;  %v2616_v4 = vld [vmem:[%s3128_s11 + $0x50] ss:$112 sps:$4 sm:$0xff]  }
 0x195   : > { %v2651_v54 = vpop.eup %2650  ;;  %v1430_v56 = vpack.c.bf16 %v2649_v53, %v2649_v53  ;;  %v1181_v57 = vpop.f32.mrb[16].mxu0 }
 0x196   : > { %v1222_v58 = vpop.f32.mrb[16].mxu1  ;;  %v1432_v61 = vpack.c.bf16 %v2651_v54, %v2651_v54  ;;  %v1182_v62 = vadd.f32 %v1181_v57, %v462_v48  ;;  %v1183_v0 = vpop.f32.mrb[17].mxu0  ;;  %v498_v48 = vrot.slane %v390_v40, %v3247_v7  ;;  %v2619_v7 = vld [vmem:[%s3128_s11 + $0x58] ss:$112 sps:$4 sm:$0xff]  }
 0x197   : > { %v1223_v63 = vadd.f32 %v1222_v58, %v470_v49  ;;  %v1224_v1 = vpop.f32.mrb[17].mxu1  ;;  %v1184_v6 = vadd.f32 %v1183_v0, %v466_v51  ;;  %1810 = vmatprep.mubr.bf16.mxu0 %v1430_v56  ;;  %v1185_v10 = vpop.f32.mrb[18].mxu0  ;;  %v506_v49 = vrot.slane %v390_v40, %v3249_v8 }
 0x198   : > { %v1225_v9 = vadd.f32 %v1224_v1, %v474_v52  ;;  %v1226_v11 = vpop.f32.mrb[18].mxu1  ;;  %2660 = vtanh.f32 %v1182_v62  ;;  %1850 = vmatprep.mubr.bf16.mxu1 %v1432_v61  ;;  %1811 = vmatmul.mubr.bf16.vlgmr.msra.gmra.mrb[36].mxu0 %v1429_v60  ;;  %v1186_v13 = vpop.f32.mrb[19].mxu0  ;;  %v2624_v61 = vld [vmem:[%s3128_s11 + $0x64] ss:$112 sps:$4 sm:$0xff]   ;;  %v2627_v1 = vld [vmem:[%s3128_s11 + $0x6c] ss:$112 sps:$4 sm:$0xff]  }
 0x199   : > { %v1227_v14 = vpop.f32.mrb[19].mxu1  ;;  %2662 = vtanh.f32 %v1223_v63  ;;  %1851 = vmatmul.mubr.bf16.vlgmr.msra.gmra.mrb[36].mxu1 %v1431_v55  ;;  %1859 = vmatpush1.bf16.xpose.msra.mxu0 %v2604_v59 }
 0x19a   : > { %v2653_v15 = vpop.eup %2652  ;;  %2664 = vtanh.f32 %v1184_v6  ;;  %1899 = vmatpush1.bf16.xpose.msra.mxu1 %v2607_v2  ;;  %1938 = vmatprep.subr.bf16.mxu0 %v2612_v3  ;;  %v2622_v14 = vld [vmem:[%s3128_s11 + $0x60] ss:$112 sps:$4 sm:$0xff]  }
 0x19b   : > { %v2655_v18 = vpop.eup %2654  ;;  %2666 = vtanh.f32 %v1225_v9  ;;  %1978 = vmatprep.subr.bf16.mxu1 %v2615_v12  ;;  %v1433_v30 = vpack.c.bf16 %v2653_v15, %v2653_v15 }
 0x19c   : > { %v2657_v23 = vpop.eup %2656  ;;  %v1435_v27 = vpack.c.bf16 %v2655_v18, %v2655_v18 }
 0x19d   : > { %v2659_v24 = vpop.eup %2658  ;;  %v1434_v28 = vpack.c.bf16 %v2657_v23, %v2657_v23  ;;  %v1263_v19 = vpop.f32.mrb[20].mxu0 }
 0x19e   : > { %v1304_v29 = vpop.f32.mrb[20].mxu1  ;;  %v1436_v31 = vpack.c.bf16 %v2659_v24, %v2659_v24  ;;  %v1264_v32 = vadd.f32 %v1263_v19, %v478_v16  ;;  %v1265_v25 = vpop.f32.mrb[21].mxu0 }
 0x19f   : > { %v1305_v33 = vadd.f32 %v1304_v29, %v486_v17  ;;  %v1306_v34 = vpop.f32.mrb[21].mxu1  ;;  %v1266_v26 = vadd.f32 %v1265_v25, %v482_v21  ;;  %1890 = vmatprep.mubr.bf16.mxu0 %v1434_v28  ;;  %v1267_v38 = vpop.f32.mrb[22].mxu0  ;;  %v2625_v17 = vld [vmem:[%s3128_s11 + $0x68] ss:$112 sps:$4 sm:$0xff]  }
 0x1a0   : > { %v1307_v37 = vadd.f32 %v1306_v34, %v490_v22  ;;  %v1308_v39 = vpop.f32.mrb[22].mxu1  ;;  %2668 = vtanh.f32 %v1264_v32  ;;  %1930 = vmatprep.mubr.bf16.mxu1 %v1436_v31  ;;  %1891 = vmatmul.mubr.bf16.vlgmr.msra.gmra.mrb[40].mxu0 %v1433_v30  ;;  %v1268_v42 = vpop.f32.mrb[23].mxu0 }
 0x1a1   : > { %v1309_v43 = vpop.f32.mrb[23].mxu1  ;;  %2670 = vtanh.f32 %v1305_v33  ;;  %1931 = vmatmul.mubr.bf16.vlgmr.msra.gmra.mrb[40].mxu1 %v1435_v27  ;;  %1939 = vmatpush1.bf16.xpose.msra.mxu0 %v2610_v20 }
 0x1a2   : > { %v2661_v44 = vpop.eup %2660  ;;  %2672 = vtanh.f32 %v1266_v26  ;;  %1979 = vmatpush1.bf16.xpose.msra.mxu1 %v2613_v35  ;;  %2018 = vmatprep.subr.bf16.mxu0 %v2618_v36 }
 0x1a3   : > { %v2663_v47 = vpop.eup %2662  ;;  %2674 = vtanh.f32 %v1307_v37  ;;  %2058 = vmatprep.subr.bf16.mxu1 %v2621_v41  ;;  %v1437_v56 = vpack.c.bf16 %v2661_v44, %v2661_v44 }
 0x1a4   : > { %v2665_v50 = vpop.eup %2664  ;;  %v1439_v52 = vpack.c.bf16 %v2663_v47, %v2663_v47 }
 0x1a5   : > { %v2667_v51 = vpop.eup %2666  ;;  %v1438_v53 = vpack.c.bf16 %v2665_v50, %v2665_v50  ;;  %v1345_v54 = vpop.f32.mrb[24].mxu0 }
 0x1a6   : > { %v1386_v55 = vpop.f32.mrb[24].mxu1  ;;  %v1440_v5 = vpack.c.bf16 %v2667_v51, %v2667_v51  ;;  %v1346_v57 = vadd.f32 %v1345_v54, %v494_v45  ;;  %v1347_v59 = vpop.f32.mrb[25].mxu0 }
 0x1a7   : > { %v1387_v58 = vadd.f32 %v1386_v55, %v502_v46  ;;  %v1388_v60 = vpop.f32.mrb[25].mxu1  ;;  %v1348_v62 = vadd.f32 %v1347_v59, %v498_v48  ;;  %1970 = vmatprep.mubr.bf16.mxu0 %v1438_v53  ;;  %v1349_v63 = vpop.f32.mrb[26].mxu0 }
 0x1a8   : > { %v1389_v8 = vadd.f32 %v1388_v60, %v506_v49  ;;  %v1390_v0 = vpop.f32.mrb[26].mxu1  ;;  %2676 = vtanh.f32 %v1346_v57  ;;  %2010 = vmatprep.mubr.bf16.mxu1 %v1440_v5  ;;  %1971 = vmatmul.mubr.bf16.vlgmr.msra.gmra.mrb[44].mxu0 %v1437_v56  ;;  %v1350_v2 = vpop.f32.mrb[27].mxu0 }
 0x1a9   : > { %v1391_v3 = vpop.f32.mrb[27].mxu1  ;;  %2678 = vtanh.f32 %v1387_v58  ;;  %2011 = vmatmul.mubr.bf16.vlgmr.msra.gmra.mrb[44].mxu1 %v1439_v52  ;;  %2019 = vmatpush1.bf16.xpose.msra.mxu0 %v2616_v4 }
 0x1aa   : > { %v2669_v6 = vpop.eup %2668  ;;  %2680 = vtanh.f32 %v1348_v62  ;;  %2059 = vmatpush1.bf16.xpose.msra.mxu1 %v2619_v7  ;;  %2098 = vmatprep.subr.bf16.mxu0 %v2624_v61 }
 0x1ab   : > { %v2671_v9 = vpop.eup %2670  ;;  %2682 = vtanh.f32 %v1389_v8  ;;  %2138 = vmatprep.subr.bf16.mxu1 %v2627_v1  ;;  %v1441_v15 = vpack.c.bf16 %v2669_v6, %v2669_v6 }
 0x1ac   : > { %v2673_v10 = vpop.eup %2672  ;;  %v1443_v12 = vpack.c.bf16 %v2671_v9, %v2671_v9 }
 0x1ad   : > { %v2675_v11 = vpop.eup %2674  ;;  %v1442_v13 = vpack.c.bf16 %v2673_v10, %v2673_v10 }
 0x1ae   : > { %v1444_v16 = vpack.c.bf16 %v2675_v11, %v2675_v11 }
 0x1af   : > { %2050 = vmatprep.mubr.bf16.mxu0 %v1442_v13 }
 0x1b0   : > { %2090 = vmatprep.mubr.bf16.mxu1 %v1444_v16  ;;  %2051 = vmatmul.mubr.bf16.vlgmr.msra.gmra.mrb[48].mxu0 %v1441_v15 }
 0x1b1   : > { %2091 = vmatmul.mubr.bf16.vlgmr.msra.gmra.mrb[48].mxu1 %v1443_v12  ;;  %2099 = vmatpush1.bf16.xpose.msra.mxu0 %v2622_v14 }
 0x1b2   : > { %v2677_v18 = vpop.eup %2676  ;;  %2139 = vmatpush1.bf16.xpose.msra.mxu1 %v2625_v17 }
 0x1b3   : > { %v2679_v21 = vpop.eup %2678  ;;  %v1445_v28 = vpack.c.bf16 %v2677_v18, %v2677_v18 }
 0x1b4   : > { %v2681_v22 = vpop.eup %2680  ;;  %v1447_v24 = vpack.c.bf16 %v2679_v21, %v2679_v21 }
 0x1b5   : > { %v2683_v23 = vpop.eup %2682  ;;  %v1446_v27 = vpack.c.bf16 %v2681_v22, %v2681_v22 }
 0x1b6   : > { %v1448_v19 = vpack.c.bf16 %v2683_v23, %v2683_v23 }
 0x1b7   : > { %2130 = vmatprep.mubr.bf16.mxu0 %v1446_v27 }
 0x1b8   : > { %2170 = vmatprep.mubr.bf16.mxu1 %v1448_v19  ;;  %2131 = vmatmul.mubr.bf16.vlgmr.msra.gmra.mrb[52].mxu0 %v1445_v28  ;;  %v1449_v19 = vld [vmem:[#allocation2] sm:$0xff] }
 0x1b9   : > { %2171 = vmatmul.mubr.bf16.vlgmr.msra.gmra.mrb[52].mxu1 %v1447_v24 }
 0x25b   : > { %v1652_v29 = vpop.f32.mrb[28].mxu0 }
 0x25c   : > { %v1692_v20 = vpop.f32.mrb[28].mxu1  ;;  %v1654_v30 = vpop.f32.mrb[29].mxu0 }
 0x25d   : > { %v1693_v31 = vadd.f32 %v1692_v20, %v1652_v29  ;;  %v1694_v32 = vpop.f32.mrb[29].mxu1  ;;  %v1655_v33 = vpop.f32.mrb[30].mxu0 }
 0x25e   : > { %v1695_v25 = vpop.f32.mrb[30].mxu1  ;;  %v1656_v34 = vpop.f32.mrb[31].mxu0 }
 0x25f   : > { %v1696_v35 = vpop.f32.mrb[31].mxu1 }
 0x260   : > { %v2416_v35 = vld [vmem:[%s3376_s4] ss:$0 sm:$0xff] (!%p2415_p0) }
 0x263   : > { %v1732_v36 = vpop.f32.mrb[32].mxu0 }
 0x264   : > { %v1733_v26 = vadd.f32 %v1732_v36, %v1693_v31  ;;  %v1772_v37 = vpop.f32.mrb[32].mxu1  ;;  %v1734_v38 = vpop.f32.mrb[33].mxu0 }
 0x265   : > { %v1774_v39 = vpop.f32.mrb[33].mxu1  ;;  %v1735_v40 = vpop.f32.mrb[34].mxu0 }
 0x266   : > { %v1773_v41 = vadd.f32 %v1772_v37, %v1733_v26  ;;  %v1775_v42 = vpop.f32.mrb[34].mxu1  ;;  %v1736_v43 = vpop.f32.mrb[35].mxu0 }
 0x267   : > { %v1776_v44 = vpop.f32.mrb[35].mxu1 }
 0x26b   : > { %v1812_v45 = vpop.f32.mrb[36].mxu0 }
 0x26c   : > { %v1813_v46 = vadd.f32 %v1812_v45, %v1773_v41  ;;  %v1852_v47 = vpop.f32.mrb[36].mxu1  ;;  %v1814_v48 = vpop.f32.mrb[37].mxu0 }
 0x26d   : > { %v1854_v49 = vpop.f32.mrb[37].mxu1  ;;  %v1815_v50 = vpop.f32.mrb[38].mxu0 }
 0x26e   : > { %v1853_v51 = vadd.f32 %v1852_v47, %v1813_v46  ;;  %v1855_v52 = vpop.f32.mrb[38].mxu1  ;;  %v1816_v53 = vpop.f32.mrb[39].mxu0 }
 0x26f   : > { %v1856_v54 = vpop.f32.mrb[39].mxu1 }
 0x273   : > { %v1892_v55 = vpop.f32.mrb[40].mxu0 }
 0x274   : > { %v1893_v4 = vadd.f32 %v1892_v55, %v1853_v51  ;;  %v1932_v56 = vpop.f32.mrb[40].mxu1  ;;  %v1894_v5 = vpop.f32.mrb[41].mxu0 }
 0x275   : > { %v1934_v57 = vpop.f32.mrb[41].mxu1  ;;  %v1895_v58 = vpop.f32.mrb[42].mxu0 }
 0x276   : > { %v1933_v59 = vadd.f32 %v1932_v56, %v1893_v4  ;;  %v1935_v60 = vpop.f32.mrb[42].mxu1  ;;  %v1896_v7 = vpop.f32.mrb[43].mxu0 }
 0x277   : > { %v1936_v61 = vpop.f32.mrb[43].mxu1 }
 0x27b   : > { %v1972_v62 = vpop.f32.mrb[44].mxu0 }
 0x27c   : > { %v1973_v8 = vadd.f32 %v1972_v62, %v1933_v59  ;;  %v2012_v63 = vpop.f32.mrb[44].mxu1  ;;  %v1974_v0 = vpop.f32.mrb[45].mxu0 }
 0x27d   : > { %v2014_v1 = vpop.f32.mrb[45].mxu1  ;;  %v1975_v2 = vpop.f32.mrb[46].mxu0 }
 0x27e   : > { %v2013_v3 = vadd.f32 %v2012_v63, %v1973_v8  ;;  %v2015_v6 = vpop.f32.mrb[46].mxu1  ;;  %v1976_v9 = vpop.f32.mrb[47].mxu0 }
 0x27f   : > { %v2016_v10 = vpop.f32.mrb[47].mxu1 }
 0x283   : > { %v2052_v11 = vpop.f32.mrb[48].mxu0 }
 0x284   : > { %v2053_v12 = vadd.f32 %v2052_v11, %v2013_v3  ;;  %v2092_v13 = vpop.f32.mrb[48].mxu1  ;;  %v2054_v14 = vpop.f32.mrb[49].mxu0 }
 0x285   : > { %v2094_v15 = vpop.f32.mrb[49].mxu1  ;;  %v2055_v16 = vpop.f32.mrb[50].mxu0 }
 0x286   : > { %v2093_v17 = vadd.f32 %v2092_v13, %v2053_v12  ;;  %v2095_v18 = vpop.f32.mrb[50].mxu1  ;;  %v2056_v21 = vpop.f32.mrb[51].mxu0 }
 0x287   : > { %v2096_v22 = vpop.f32.mrb[51].mxu1 }
 0x28b   : > { %v2132_v23 = vpop.f32.mrb[52].mxu0 }
 0x28c   : > { %v2133_v24 = vadd.f32 %v2132_v23, %v2093_v17  ;;  %v2172_v27 = vpop.f32.mrb[52].mxu1  ;;  %v2134_v28 = vpop.f32.mrb[53].mxu0  ;;  %2184 = sbr.rel (%p2415_p0) target bundleno = 669 (0x29d), region = 64 }
 0x28d   : > { %v2174_v29 = vpop.f32.mrb[53].mxu1  ;;  %v2135_v20 = vpop.f32.mrb[54].mxu0 }
 0x28e   : > { %v2173_v30 = vadd.f32 %v2172_v27, %v2133_v24  ;;  %v2175_v31 = vpop.f32.mrb[54].mxu1  ;;  %v2136_v32 = vpop.f32.mrb[55].mxu0 }
 0x28f   : > { %v2176_v33 = vpop.f32.mrb[55].mxu1 }
 0x290   : > { %v2178_v25 = vadd.f32 %v2173_v30, %v1449_v19 }
 0x292   : > { %2180 = vst.msk [vmem:[#allocation2] sm:$0xff] %vm2179_vm2, %v2178_v25 }
 0x299   : > { %v2185_v34 = vld [vmem:[#allocation2] sm:$0xff] }
 0x29a   : > { %v2193_v36 = vadd.f32 %v2416_v35, %v2185_v34 }
 0x29c   : > { %2194 = vst.msk [vmem:[#allocation11] sm:$0xff] %vm2179_vm2, %v2193_v36 }
 0x29d PF: > { %p2461_p4 = scmp.eq.s32.totalorder %s3002_s14, 1  ;;  %s2885_s26 = smov [#allocation11]  }
 0x29e   : > { %s2202_s17 = sshll.u32 %s2885_s26, 4  ;;  %s2203_s17 = int_to_ptr.vmem [resolvable:$true] %s2202_s17 }
 0x29f   : > { %s2802_s24 = scalar_lea.vmem %s2203_s17, 128  ;;  %p2809_p7 = scmp.lt.s32.totalorder %s2203_s17, %s2203_s17 }
 0x2a0   : > { %p2803_p8 = scmp.ne.s32.totalorder %s2203_s17, %s2802_s24  ;;  %p2810_p12 = scmp.lt.s32.totalorder %s2802_s24, %s2802_s24 }
 0x2a2   : > { %p2804_p2 = pnand %p2803_p8, %p2461_p4  ;;  %p2811_p3 = por %p2810_p12, %p2809_p7 }
 0x2a4   : > { %p2805_p5 = pneg %p2804_p2 }
 0x2a6   : > { %p2812_p9 = pnand %p2811_p3, %p2805_p5 }
 0x2a8   : > { %2815 = shalt.err (!%p2812_p9)
}
 0x2a9   : > { %s2816_s30 = scalar_lea.hbm %s3377_s5, 128 }
 0x2aa   : > { %p2817_p10 = scmp.ne.s32.totalorder %s3377_s5, %s2816_s30  ;;  %p2822_p13 = scmp.lt.u32.totalorder %s2816_s30, %s3377_s5 }
 0x2ac   : > { %p2818_p1 = pnand %p2817_p10, %p2461_p4 }
 0x2ae   : > { %p2819_p6 = pneg %p2818_p1 }
 0x2b0   : > { %p2824_p11 = pnand %p2822_p13, %p2819_p6 }
 0x2b2   : > { %2827 = shalt.err (!%p2824_p11)
}
 0x2b3   : > { %2441 = dma.vmem_to_hbm [thread:$0]  (%p2461_p4), %s2203_s17, 128, %s3377_s5, [#allocation5]  }
 0x2b4   : > { %2857 = dma.done.wait (%p2461_p4), [#allocation5], 128  }
 0x2b5   : > { %2859 = vsyncadd (%p2461_p4), [#allocation5], 4294967168 }
 0x2b6 PF: > { %p20_p0 = scmp.ge.s32.totalorder %s2937_s22, 4   ;;  %s3407_s18 = smov %s2866_s19 }
 0x2b7   : > { %s3408_s19 = smov %s2870_s20  ;;  %s3409_s20 = smov %s2947_s25 }
 0x2b8   : > { %s3410_s21 = smov %s2937_s22  ;;  %22 = sbr.rel (!%p20_p0) target bundleno = 9 (0x9), region = 114 }
 0x2bf   :  { %2215 = vsyncpa [#allocation4], 1 }
 0x2c0   :  { %2217 = vsyncpa [#allocation4 + $0x1], 1 }
 0x2c1   :  { %2218 = vsyncpa [#allocation7], 1 }
 0x2c2   :  { %2220 = vsyncpa [#allocation7 + $0x1], 1 }
 0x2c3   :  { %2221 = vsyncpa [#allocation10], 1 }
 0x2c4   :  { %2223 = vsyncpa [#allocation10 + $0x1], 1 }
 0x2c5   :  { %2224 = vsyncpa [#allocation5], 1 }
 0x2c6   :  { %2226 = vsyncpa [#allocation5 + $0x1], 1 }

</bundles_post_ra>
